<compile_context>
chip_gen: v6e
topology: v6e:2x2x1
jax: 0.10.0
libtpu: 0.0.40
codegen_flags: <defaults>
</compile_context>

<pallas_src>
import jax
import jax.numpy as jnp
from jax.experimental import pallas as pl
from jax.experimental.pallas import tpu as pltpu

HIDDEN1 = 512
HIDDEN2 = 256
NEG_SLOPE = 0.2


def _round_up(n, m):
    return (n + m - 1) // m * m


def _encoder_kernel(x_ref, w1_ref, b1_ref, w2_ref, b2_ref, o_ref):
    # x_ref:  [tb, d_in]     native dtype (f32/bf16), pipelined per grid step
    # w1_ref: [d_in, 512]    bf16, VMEM resident across the grid
    # b1_ref: [1, 512]       f32
    # w2_ref: [512, 256]     bf16, VMEM resident
    # b2_ref: [1, 256]       f32
    # o_ref:  [tb, 256]      out_dtype
    x = x_ref[...].astype(w1_ref.dtype)            # in-kernel bf16 cast (VPU)

    # Block 1: Linear -> LeakyReLU(0.2); Dropout(p=0) is identity.
    h = jnp.dot(x, w1_ref[...], preferred_element_type=jnp.float32)
    h = h + b1_ref[...]
    h = jnp.where(h >= 0, h, NEG_SLOPE * h)

    # Block 2: Linear -> LeakyReLU(0.2); Dropout(p=0.3) is identity (eval).
    y = jnp.dot(h.astype(w2_ref.dtype), w2_ref[...],
                preferred_element_type=jnp.float32)
    y = y + b2_ref[...]
    y = jnp.where(y >= 0, y, NEG_SLOPE * y)

    o_ref[...] = y.astype(o_ref.dtype)


def _hw_info():
    """Best-effort (vmem_bytes_per_core, dual_tensorcore)."""
    vmem_bytes = 64 * 1024 * 1024              # conservative default
    try:
        info = pltpu.get_tpu_info()
        vmem_bytes = int(getattr(info, "vmem_capacity_bytes", vmem_bytes))
    except Exception:
        pass                                    # hardware query only; tiling falls back
    # v7x is the only generation with 64 MiB-per-TensorCore VMEM and 2 TCs/chip.
    dual_tc = vmem_bytes <= 64 * 1024 * 1024
    return vmem_bytes, dual_tc


def _choose_tb(batch, d_in, x_itemsize, out_itemsize, vmem_bytes, dual_tc):
    """Row tile: largest that fits the activation budget; split into >=2
    balanced steps only on dual-TensorCore chips; MXU/bf16-friendly multiples."""
    quantum = 16 if batch >= 16 else 8
    cap = 512 if dual_tc else 2048
    tb = min(cap, _round_up(batch, quantum))
    if dual_tc and batch > quantum:
        # >= 2 grid steps so the "parallel" batch axis shards across both TCs.
        tb = min(tb, _round_up(pl.cdiv(batch, 2), quantum))

    # Keep double-buffered x/out tiles plus the f32 intermediate in budget
    # (weights + compiler scratch use the rest of VMEM).
    budget = min(vmem_bytes // 4, 24 * 1024 * 1024)
    while tb > quantum:
        tile_bytes = (2 * tb * d_in * x_itemsize
                      + 2 * tb * HIDDEN2 * out_itemsize
                      + tb * HIDDEN1 * 4)
        if tile_bytes <= budget:
            break
        tb = max(quantum, _round_up(tb // 2, quantum))

    # Snap down to an MXU-friendly multiple when it does not add a grid step.
    for mult in (256, 128):
        snapped = (tb // mult) * mult
        if snapped >= mult and pl.cdiv(batch, snapped) == pl.cdiv(batch, tb):
            tb = snapped
            break
    return tb


def _vmem_limit(tb, d_in, x_itemsize, out_itemsize):
    """Scoped-VMEM limit from the actual footprint, with margin and a 48 MiB
    cap so even v7x (64 MiB physical) keeps headroom."""
    need = (2 * tb * d_in * x_itemsize            # double-buffered x tile
            + 2 * tb * HIDDEN2 * out_itemsize     # double-buffered out tile
            + 2 * (d_in * HIDDEN1 * 2 + HIDDEN1 * 4)       # W1^T + b1
            + 2 * (HIDDEN1 * HIDDEN2 * 2 + HIDDEN2 * 4)    # W2^T + b2
            + tb * HIDDEN1 * 4)                   # f32 intermediate h
    limit = int(need * 1.5) + (4 << 20)
    return max(16 << 20, min(limit, 48 << 20))


def encoder_forward(x, params, *, tb=None, out_dtype=None):
    """x: [B, d_in] float32/bfloat16.  params from init_params().
    Pass out_dtype=jnp.bfloat16 when the consumer accepts it: for small d_in
    the output is the largest HBM stream and bf16 halves the writeback."""
    B, d_in = x.shape
    w1t = params["w1t"]
    w2t = params["w2t"]
    assert w1t.shape == (d_in, HIDDEN1), (w1t.shape, d_in)
    assert w2t.shape == (HIDDEN1, HIDDEN2)
    b1 = params["b1"].reshape(1, HIDDEN1).astype(jnp.float32)
    b2 = params["b2"].reshape(1, HIDDEN2).astype(jnp.float32)
    out_dtype = x.dtype if out_dtype is None else out_dtype

    x_itemsize = jnp.dtype(x.dtype).itemsize
    out_itemsize = jnp.dtype(out_dtype).itemsize
    vmem_bytes, dual_tc = _hw_info()

    # Residency guard for very large input_size.
    # TODO(synk): add a K grid axis ("arbitrary", reduction-last) with an f32
    #             accumulator scratch when resident W1 no longer fits VMEM.
    w_resident = 2 * (d_in * HIDDEN1 * 2 + HIDDEN1 * HIDDEN2 * 2)
    if w_resident > vmem_bytes // 2:
        raise ValueError(
            f"input_size={d_in}: resident weights ({w_resident} B) exceed half "
            f"of VMEM ({vmem_bytes} B); K-tiling not implemented.")

    if tb is None:
        tb = _choose_tb(B, d_in, x_itemsize, out_itemsize, vmem_bytes, dual_tc)
    tb = _round_up(max(8, min(int(tb), B)), 8)
    if pl.cdiv(B, tb) == 1:
        tb = B          # exact single block (block dim == full dim is exempt)
    grid = (pl.cdiv(B, tb),)

    cost = pl.CostEstimate(
        flops=2 * B * (d_in * HIDDEN1 + HIDDEN1 * HIDDEN2),
        transcendentals=0,
        bytes_accessed=(B * d_in * x_itemsize
                        + d_in * HIDDEN1 * 2 + HIDDEN1 * 4
                        + HIDDEN1 * HIDDEN2 * 2 + HIDDEN2 * 4
                        + B * HIDDEN2 * out_itemsize),
    )

    return pl.pallas_call(
        _encoder_kernel,
        out_shape=jax.ShapeDtypeStruct((B, HIDDEN2), out_dtype),
        grid_spec=pltpu.PrefetchScalarGridSpec(
            num_scalar_prefetch=0,
            grid=grid,
            in_specs=[
                pl.BlockSpec((tb, d_in), lambda i: (i, 0)),          # x tile
                pl.BlockSpec((d_in, HIDDEN1), lambda i: (0, 0)),     # W1^T resident
                pl.BlockSpec((1, HIDDEN1), lambda i: (0, 0)),        # b1
                pl.BlockSpec((HIDDEN1, HIDDEN2), lambda i: (0, 0)),  # W2^T resident
                pl.BlockSpec((1, HIDDEN2), lambda i: (0, 0)),        # b2
            ],
            out_specs=pl.BlockSpec((tb, HIDDEN2), lambda i: (i, 0)),
        ),
        compiler_params=pltpu.CompilerParams(
            dimension_semantics=("parallel",),
            vmem_limit_bytes=_vmem_limit(tb, d_in, x_itemsize, out_itemsize),
        ),
        cost_estimate=cost,
    )(x, w1t, b1, w2t, b2)


def init_params(key, input_size):
    """nn.Linear-style init (uniform +/- 1/sqrt(fan_in)); weights stored
    pre-transposed to [in, out] in bf16 so both matmuls are x @ W on the MXU."""
    k1, k2, k3, k4 = jax.random.split(key, 4)
    bound1 = 1.0 / (input_size ** 0.5)
    bound2 = 1.0 / (HIDDEN1 ** 0.5)
    w1 = jax.random.uniform(k1, (HIDDEN1, input_size), jnp.float32, -bound1, bound1)
    b1 = jax.random.uniform(k2, (HIDDEN1,), jnp.float32, -bound1, bound1)
    w2 = jax.random.uniform(k3, (HIDDEN2, HIDDEN1), jnp.float32, -bound2, bound2)
    b2 = jax.random.uniform(k4, (HIDDEN2,), jnp.float32, -bound2, bound2)
    return {
        "w1t": w1.T.astype(jnp.bfloat16),          # [d_in, 512]
        "b1": b1.reshape(1, HIDDEN1),              # f32
        "w2t": w2.T.astype(jnp.bfloat16),          # [512, 256]
        "b2": b2.reshape(1, HIDDEN2),              # f32
    }


def _reference(x, params):
    """Pure-JAX reference with matching bf16-input / f32-accumulate math."""
    f32 = jnp.float32
    xr = x.astype(jnp.bfloat16).astype(f32)
    h = xr @ params["w1t"].astype(f32) + params["b1"].reshape(1, -1)
    h = jnp.where(h >= 0, h, NEG_SLOPE * h)
    y = (h.astype(jnp.bfloat16).astype(f32) @ params["w2t"].astype(f32)
         + params["b2"].reshape(1, -1))
    y = jnp.where(y >= 0, y, NEG_SLOPE * y)
    return y


if __name__ == "__main__":
    key = jax.random.PRNGKey(0)
    kx1, kx2, kp = jax.random.split(key, 3)

    # Small shape matching the original test (B=8, input_size=32).
    batch, input_size = 8, 32
    params = init_params(kp, input_size)
    x = jax.random.normal(kx1, (batch, input_size), jnp.float32)
    out = jax.block_until_ready(encoder_forward(x, params))
    assert out.shape == (batch, HIDDEN2)
    assert out.dtype == x.dtype
    assert jnp.allclose(out, _reference(x, params), atol=1e-3, rtol=1e-3)

    # Second shape: ragged batch (no wrapper-side padding/slicing), non-128 K,
    # possible multi-step grid, plus the bf16-output writeback path.
    batch2, input_size2 = 200, 96
    params2 = init_params(kp, input_size2)
    x2 = jax.random.normal(kx2, (batch2, input_size2), jnp.float32)
    out2 = jax.block_until_ready(encoder_forward(x2, params2))
    assert out2.shape == (batch2, HIDDEN2)
    ref2 = _reference(x2, params2)
    assert jnp.allclose(out2, ref2, atol=1e-3, rtol=1e-3)

    out2_bf16 = jax.block_until_ready(
        encoder_forward(x2, params2, out_dtype=jnp.bfloat16))
    assert out2_bf16.dtype == jnp.bfloat16
    assert jnp.allclose(out2_bf16.astype(jnp.float32), ref2, atol=5e-2, rtol=5e-2)

    # Explicit multi-step grid (ragged last block) on any generation.
    out3 = jax.block_until_ready(encoder_forward(x2, params2, tb=64))
    assert jnp.allclose(out3, ref2, atol=1e-3, rtol=1e-3)

    print("KERNEL_OK")
</pallas_src>

<mosaic_0001>
module attributes {stable_mosaic.version = 11 : i64} {
  func.func @_encoder_kernel(%arg0: i32, %arg1: memref<8x32xf32, #tpu.memory_space<vmem>>, %arg2: memref<32x512xbf16, #tpu.memory_space<vmem>>, %arg3: memref<1x512xf32, #tpu.memory_space<vmem>>, %arg4: memref<512x256xbf16, #tpu.memory_space<vmem>>, %arg5: memref<1x256xf32, #tpu.memory_space<vmem>>, %arg6: memref<8x256xf32, #tpu.memory_space<vmem>>) attributes {dimension_semantics = [#tpu.dimension_semantics<parallel>], iteration_bounds = array<i64: 1>, scalar_prefetch = 0 : i64, scratch_operands = 0 : i64, tpu.core_type = #tpu.core_type<tc>, window_params = [{transform_indices = @transform_0, window_bounds = array<i64: 8, 32>}, {pipeline_mode = #tpu.pipeline_mode<synchronous>, transform_indices = @transform_1, window_bounds = array<i64: 32, 512>}, {pipeline_mode = #tpu.pipeline_mode<synchronous>, transform_indices = @transform_2, window_bounds = array<i64: 1, 512>}, {pipeline_mode = #tpu.pipeline_mode<synchronous>, transform_indices = @transform_3, window_bounds = array<i64: 512, 256>}, {pipeline_mode = #tpu.pipeline_mode<synchronous>, transform_indices = @transform_4, window_bounds = array<i64: 1, 256>}, {transform_indices = @transform_5, window_bounds = array<i64: 8, 256>}]} {
    %c0 = arith.constant 0 : index
    %c0_0 = arith.constant 0 : index
    %0 = vector.load %arg1[%c0, %c0_0] : memref<8x32xf32, #tpu.memory_space<vmem>>, vector<8x32xf32>
    %1 = arith.truncf %0 : vector<8x32xf32> to vector<8x32xbf16>
    %c0_1 = arith.constant 0 : index
    %c0_2 = arith.constant 0 : index
    %2 = vector.load %arg2[%c0_1, %c0_2] : memref<32x512xbf16, #tpu.memory_space<vmem>>, vector<32x512xbf16>
    %cst = arith.constant dense<0.000000e+00> : vector<8x512xf32>
    %3 = tpu.matmul %1, %2, %cst {dimension_numbers = #tpu.dot_dimension_numbers<[1], [0], [0], [1], [0, 0, 1, 1], [], []>} : vector<8x32xbf16>, vector<32x512xbf16>, vector<8x512xf32> -> vector<8x512xf32>
    %c0_3 = arith.constant 0 : index
    %c0_4 = arith.constant 0 : index
    %4 = vector.load %arg3[%c0_3, %c0_4] : memref<1x512xf32, #tpu.memory_space<vmem>>, vector<1x512xf32>
    %5 = vector.broadcast %4 : vector<1x512xf32> to vector<8x512xf32>
    %6 = arith.addf %3, %5 : vector<8x512xf32>
    %cst_5 = arith.constant 0.000000e+00 : f32
    %7 = vector.broadcast %cst_5 : f32 to vector<8x512xf32>
    %8 = arith.cmpf oge, %6, %7 : vector<8x512xf32>
    %cst_6 = arith.constant 2.000000e-01 : f32
    %9 = vector.broadcast %cst_6 : f32 to vector<8x512xf32>
    %10 = arith.mulf %9, %6 : vector<8x512xf32>
    %11 = arith.select %8, %6, %10 : vector<8x512xi1>, vector<8x512xf32>
    %12 = arith.truncf %11 : vector<8x512xf32> to vector<8x512xbf16>
    %c0_7 = arith.constant 0 : index
    %c0_8 = arith.constant 0 : index
    %13 = vector.load %arg4[%c0_7, %c0_8] : memref<512x256xbf16, #tpu.memory_space<vmem>>, vector<512x256xbf16>
    %cst_9 = arith.constant dense<0.000000e+00> : vector<8x256xf32>
    %14 = tpu.matmul %12, %13, %cst_9 {dimension_numbers = #tpu.dot_dimension_numbers<[1], [0], [0], [1], [0, 0, 1, 1], [], []>} : vector<8x512xbf16>, vector<512x256xbf16>, vector<8x256xf32> -> vector<8x256xf32>
    %c0_10 = arith.constant 0 : index
    %c0_11 = arith.constant 0 : index
    %15 = vector.load %arg5[%c0_10, %c0_11] : memref<1x256xf32, #tpu.memory_space<vmem>>, vector<1x256xf32>
    %16 = vector.broadcast %15 : vector<1x256xf32> to vector<8x256xf32>
    %17 = arith.addf %14, %16 : vector<8x256xf32>
    %cst_12 = arith.constant 0.000000e+00 : f32
    %18 = vector.broadcast %cst_12 : f32 to vector<8x256xf32>
    %19 = arith.cmpf oge, %17, %18 : vector<8x256xf32>
    %cst_13 = arith.constant 2.000000e-01 : f32
    %20 = vector.broadcast %cst_13 : f32 to vector<8x256xf32>
    %21 = arith.mulf %20, %17 : vector<8x256xf32>
    %22 = arith.select %19, %17, %21 : vector<8x256xi1>, vector<8x256xf32>
    %c0_14 = arith.constant 0 : index
    %c0_15 = arith.constant 0 : index
    %23 = vector.load %arg6[%c0_14, %c0_15] : memref<8x256xf32, #tpu.memory_space<vmem>>, vector<8x256xf32>
    tpu.vector_store %arg6[%c0_14, %c0_15], %22 {strides = array<i32>} : memref<8x256xf32, #tpu.memory_space<vmem>>, vector<8x256xf32>,
    return
  }
  func.func @transform_0(%arg0: i32) -> (i32, i32) {
    %c0_i32 = arith.constant 0 : i32
    %c0_i32_0 = arith.constant 0 : i32
    return %arg0, %c0_i32 : i32, i32
  }
  func.func @transform_1(%arg0: i32) -> (i32, i32) {
    %c0_i32 = arith.constant 0 : i32
    %c0_i32_0 = arith.constant 0 : i32
    %c0_i32_1 = arith.constant 0 : i32
    return %c0_i32, %c0_i32_0 : i32, i32
  }
  func.func @transform_2(%arg0: i32) -> (i32, i32) {
    %c0_i32 = arith.constant 0 : i32
    %c0_i32_0 = arith.constant 0 : i32
    %c0_i32_1 = arith.constant 0 : i32
    return %c0_i32, %c0_i32_0 : i32, i32
  }
  func.func @transform_3(%arg0: i32) -> (i32, i32) {
    %c0_i32 = arith.constant 0 : i32
    %c0_i32_0 = arith.constant 0 : i32
    %c0_i32_1 = arith.constant 0 : i32
    return %c0_i32, %c0_i32_0 : i32, i32
  }
  func.func @transform_4(%arg0: i32) -> (i32, i32) {
    %c0_i32 = arith.constant 0 : i32
    %c0_i32_0 = arith.constant 0 : i32
    %c0_i32_1 = arith.constant 0 : i32
    return %c0_i32, %c0_i32_0 : i32, i32
  }
  func.func @transform_5(%arg0: i32) -> (i32, i32) {
    %c0_i32 = arith.constant 0 : i32
    %c0_i32_0 = arith.constant 0 : i32
    return %arg0, %c0_i32 : i32, i32
  }
}

</mosaic_0001>

<bundles_post_ra>
// kernel: tpu_custom_call.1
= control target key start
LH: loop header
LB: loop body
LE: loop exit
PB: predicated region body
PF: predicated region fallthrough
CT: control target
= control target key end

     0   :  { %10 = vsyncpa [#allocation3], 0  ;;  %s1108_s0 = inlined_call_operand.hbm [shape: f32[8,32], index: 0, kind: input, shape index: {}]   ;;  %s1109_s1 = inlined_call_operand.hbm [shape: bf16[32,512], index: 1, kind: input, shape index: {}]   ;;  %s1110_s2 = inlined_call_operand.hbm [shape: f32[1,512], index: 2, kind: input, shape index: {}]   ;;  %s1111_s3 = inlined_call_operand.hbm [shape: bf16[512,256], index: 3, kind: input, shape index: {}]   ;;  %s1112_s4 = inlined_call_operand.vmem [shape: f32[1,256], index: 4, kind: input, shape index: {}]   ;;  %s1113_s5 = inlined_call_operand.hbm [shape: f32[8,256], index: 5, kind: output, shape index: {}]  }
   0x1   :  { %11 = vsyncpa [#allocation6], 0 }
   0x2   :  { %12 = vsyncpa [#allocation9], 0 }
   0x3   :  { %13 = vsyncpa [#allocation4], 0  ;;  %s1050_s18 = smov [#allocation5]  }
   0x4   :  { %s29_s19 = sshll.u32 %s1050_s18, 4  ;;  %s30_s19 = int_to_ptr.vmem [resolvable:$true] %s29_s19 }
   0x5   :  { %s950_s20 = scalar_lea.vmem %s30_s19, 1024  ;;  %p955_p1 = scmp.lt.s32.totalorder %s30_s19, %s30_s19 }
   0x6   :  { %p951_p0 = scmp.ne.s32.totalorder %s30_s19, %s950_s20  ;;  %p956_p2 = scmp.lt.s32.totalorder %s950_s20, %s950_s20 }
   0x8   :  { %p957_p3 = por %p956_p2, %p955_p1 }
   0xa   :  { %p958_p4 = pnand %p957_p3, %p951_p0 }
   0xc   :  { %961 = shalt.err (!%p958_p4)
}
   0xd   :  { %s1051_s21 = smov 256   ;;  %s1052_s22 = smov 16  }
   0xe   :  { %35 = dma.hbm_to_vmem [thread:$0]  %s1109_s1, 1024, %s30_s19, [#allocation6], %s1051_s21, %s1051_s21, %s1052_s22  }
   0xf   :  { %s1053_s25 = smov [#allocation2]   ;;  %s1054_s27 = smov [#allocation7]  }
  0x10   :  { %s20_s26 = sshll.u32 %s1053_s25, 4  ;;  %s42_s28 = sshll.u32 %s1054_s27, 4  ;;  %s21_s26 = int_to_ptr.vmem [resolvable:$true] %s20_s26  ;;  %s43_s28 = int_to_ptr.vmem [resolvable:$true] %s42_s28 }
  0x11   :  { %s970_s29 = scalar_lea.vmem %s21_s26, 128  ;;  %p975_p6 = scmp.lt.s32.totalorder %s21_s26, %s21_s26 }
  0x12   :  { %p971_p5 = scmp.ne.s32.totalorder %s21_s26, %s970_s29  ;;  %p976_p7 = scmp.lt.s32.totalorder %s970_s29, %s970_s29 }
  0x14   :  { %p977_p8 = por %p976_p7, %p975_p6 }
  0x16   :  { %p978_p9 = pnand %p977_p8, %p971_p5 }
  0x18   :  { %981 = shalt.err (!%p978_p9)
}
  0x19   :  { %23 = dma.hbm_to_vmem [thread:$0]  %s1108_s0, 128, %s21_s26, [#allocation3]  }
  0x1a   :  { %s990_s7 = scalar_lea.vmem %s43_s28, 64  ;;  %p995_p11 = scmp.lt.s32.totalorder %s43_s28, %s43_s28 }
  0x1b   :  { %p991_p10 = scmp.ne.s32.totalorder %s43_s28, %s990_s7  ;;  %p996_p12 = scmp.lt.s32.totalorder %s990_s7, %s990_s7 }
  0x1d   :  { %p997_p13 = por %p996_p12, %p995_p11 }
  0x1f   :  { %p998_p0 = pnand %p997_p13, %p991_p10 }
  0x21   :  { %1001 = shalt.err (!%p998_p0)
}
  0x22   :  { %45 = dma.hbm_to_vmem [thread:$0]  %s1110_s2, 64, %s43_s28, [#allocation6]  }
  0x23   :  { %s1055_s9 = smov [#allocation8]  }
  0x24   :  { %s51_s10 = sshll.u32 %s1055_s9, 4  ;;  %s52_s10 = int_to_ptr.vmem [resolvable:$true] %s51_s10 }
  0x25   :  { %s1010_s11 = scalar_lea.vmem %s52_s10, 8192  ;;  %p1015_p2 = scmp.lt.s32.totalorder %s52_s10, %s52_s10 }
  0x26   :  { %p1011_p1 = scmp.ne.s32.totalorder %s52_s10, %s1010_s11  ;;  %p1016_p3 = scmp.lt.s32.totalorder %s1010_s11, %s1010_s11 }
  0x28   :  { %p1017_p4 = por %p1016_p3, %p1015_p2 }
  0x2a   :  { %p1018_p5 = pnand %p1017_p4, %p1011_p1 }
  0x2c   :  { %1021 = shalt.err (!%p1018_p5)
}
  0x2d   :  { %s1056_s0 = smov 128   ;;  %s1057_s12 = smov 8  }
  0x2e   :  { %57 = dma.hbm_to_vmem [thread:$0]  %s1111_s3, 8192, %s52_s10, [#allocation9], %s1056_s0, %s1056_s0, %s1057_s12  }
  0x2f   :  { %1042 = dma.done.wait [#allocation3], 128  }
  0x30   :  { %1043 = vsyncadd [#allocation3], 4294967168 }
  0x31   :  { %1044 = dma.done.wait [#allocation6], 1088  }
  0x32   :  { %1045 = vsyncadd [#allocation6], 4294966208 }
  0x33   :  { %1046 = dma.done.wait [#allocation9], 8192  }
  0x34   :  { %1047 = vsyncadd [#allocation9], 4294959104  ;;  %v1058_v0 = vmov 0   ;;  %v834_v1 = vld [vmem:[#allocation5 + $0x24] ss:$16 sps:$4 sm:$0xff]   ;;  %v73_v9 = vld [vmem:[#allocation2] sm:$0xff] }
  0x35   :  { %181 = vmatprep.mubr.bf16.mxu0 %v1058_v0  ;;  %222 = vmatprep.mubr.bf16.mxu1 %v1058_v0  ;;  %v836_v2 = vld [vmem:[#allocation5 + $0x2c] ss:$16 sps:$4 sm:$0xff]   ;;  %v838_v3 = vld [vmem:[#allocation5 + $0x20] ss:$16 sps:$4 sm:$0xff]   ;;  %v839_v4 = vld [vmem:[#allocation5 + $0x28] ss:$16 sps:$4 sm:$0xff]   ;;  %v74_v12 = vpack.c.bf16 %v73_v9, %v73_v9 }
  0x36   :  { %161 = vmatprep.subr.bf16.mxu0 %v834_v1  ;;  %202 = vmatprep.subr.bf16.mxu1 %v836_v2  ;;  %v840_v5 = vld [vmem:[#allocation5 + $0x4] ss:$16 sps:$4 sm:$0xff]   ;;  %v842_v6 = vld [vmem:[#allocation5 + $0xc] ss:$16 sps:$4 sm:$0xff]   ;;  %v844_v7 = vld [vmem:[#allocation5] ss:$16 sps:$4 sm:$0xff]  }
  0x37   :  { %162 = vmatpush1.bf16.msra.mxu0 %v838_v3  ;;  %203 = vmatpush1.bf16.msra.mxu1 %v839_v4  ;;  %v845_v8 = vld [vmem:[#allocation5 + $0x8] ss:$16 sps:$4 sm:$0xff]   ;;  %v846_v10 = vld [vmem:[#allocation8 + $0x70] ss:$8 sps:$4 sm:$0xff]   ;;  %vm145_vm0 = vcmask 261120   ;;  %s1059_s15 = smov [#allocation10]  }
  0x38   :  { %163 = vmatprep.subr.bf16.mxu0 %v840_v5  ;;  %204 = vmatprep.subr.bf16.mxu1 %v842_v6  ;;  %v848_v11 = vld [vmem:[#allocation8 + $0x74] ss:$8 sps:$4 sm:$0xff]   ;;  %v849_v13 = vld [vmem:[#allocation8 + $0x170] ss:$8 sps:$4 sm:$0xff]   ;;  %v854_v15 = vld [vmem:[#allocation8 + $0x64] ss:$8 sps:$4 sm:$0xff]  }
  0x39   :  { %v851_v14 = vld [vmem:[#allocation8 + $0x174] ss:$8 sps:$4 sm:$0xff]   ;;  %v857_v16 = vld [vmem:[#allocation8 + $0x164] ss:$8 sps:$4 sm:$0xff]   ;;  %v852_v17 = vld [vmem:[#allocation8 + $0x60] ss:$8 sps:$4 sm:$0xff]  }
  0x3a   :  { %v855_v18 = vld [vmem:[#allocation8 + $0x160] ss:$8 sps:$4 sm:$0xff]   ;;  %v860_v19 = vld [vmem:[#allocation8 + $0x54] ss:$8 sps:$4 sm:$0xff]   ;;  %v858_v21 = vld [vmem:[#allocation8 + $0x50] ss:$8 sps:$4 sm:$0xff]  }
  0x3b   :  { %164 = vmatpush1.bf16.msra.mxu0 %v844_v7  ;;  %205 = vmatpush1.bf16.msra.mxu1 %v845_v8  ;;  %v863_v20 = vld [vmem:[#allocation8 + $0x154] ss:$8 sps:$4 sm:$0xff]   ;;  %v861_v22 = vld [vmem:[#allocation8 + $0x150] ss:$8 sps:$4 sm:$0xff]   ;;  %v866_v23 = vld [vmem:[#allocation8 + $0x44] ss:$8 sps:$4 sm:$0xff]  }
  0x3c   :  { %643 = vmatprep.subr.bf16.mxu0 %v848_v11  ;;  %684 = vmatprep.subr.bf16.mxu1 %v851_v14  ;;  %v869_v24 = vld [vmem:[#allocation8 + $0x144] ss:$8 sps:$4 sm:$0xff]   ;;  %v864_v25 = vld [vmem:[#allocation8 + $0x40] ss:$8 sps:$4 sm:$0xff]   ;;  %v872_v27 = vld [vmem:[#allocation8 + $0x34] ss:$8 sps:$4 sm:$0xff]   ;;  %v85_v11 = vlaneseq }
  0x3d   :  { %v867_v26 = vld [vmem:[#allocation8 + $0x140] ss:$8 sps:$4 sm:$0xff]   ;;  %v875_v28 = vld [vmem:[#allocation8 + $0x134] ss:$8 sps:$4 sm:$0xff]   ;;  %v870_v29 = vld [vmem:[#allocation8 + $0x30] ss:$8 sps:$4 sm:$0xff]  }
  0x3e   :  { %758 = vmatmul.mubr.msk.bf16.vlgmr.msra.gmra.mxu0 %vm145_vm0, %v74_v12  ;;  %759 = vmatmul.mubr.msk.bf16.vlgmr.msra.gmra.mxu1 %vm145_vm0, %v74_v12  ;;  %v873_v30 = vld [vmem:[#allocation8 + $0x130] ss:$8 sps:$4 sm:$0xff]   ;;  %v878_v31 = vld [vmem:[#allocation8 + $0x24] ss:$8 sps:$4 sm:$0xff]   ;;  %v876_v33 = vld [vmem:[#allocation8 + $0x20] ss:$8 sps:$4 sm:$0xff]  }
  0x3f   :  { %644 = vmatpush1.bf16.msra.mxu0 %v846_v10  ;;  %685 = vmatpush1.bf16.msra.mxu1 %v849_v13  ;;  %v881_v32 = vld [vmem:[#allocation8 + $0x124] ss:$8 sps:$4 sm:$0xff]   ;;  %v879_v34 = vld [vmem:[#allocation8 + $0x120] ss:$8 sps:$4 sm:$0xff]   ;;  %v884_v35 = vld [vmem:[#allocation8 + $0x14] ss:$8 sps:$4 sm:$0xff]  }
  0x40   :  { %645 = vmatprep.subr.bf16.mxu0 %v854_v15  ;;  %686 = vmatprep.subr.bf16.mxu1 %v857_v16  ;;  %v887_v36 = vld [vmem:[#allocation8 + $0x114] ss:$8 sps:$4 sm:$0xff]   ;;  %v882_v37 = vld [vmem:[#allocation8 + $0x10] ss:$8 sps:$4 sm:$0xff]   ;;  %v890_v39 = vld [vmem:[#allocation8 + $0x4] ss:$8 sps:$4 sm:$0xff]  }
  0x41   :  { %v885_v38 = vld [vmem:[#allocation8 + $0x110] ss:$8 sps:$4 sm:$0xff]   ;;  %v893_v40 = vld [vmem:[#allocation8 + $0x104] ss:$8 sps:$4 sm:$0xff]   ;;  %v888_v41 = vld [vmem:[#allocation8] ss:$8 sps:$4 sm:$0xff]  }
  0x42   :  { %v891_v42 = vld [vmem:[#allocation8 + $0x100] ss:$8 sps:$4 sm:$0xff]   ;;  %v896_v43 = vld [vmem:[#allocation8 + $0xf4] ss:$8 sps:$4 sm:$0xff]   ;;  %v894_v45 = vld [vmem:[#allocation8 + $0xf0] ss:$8 sps:$4 sm:$0xff]  }
  0x43   :  { %646 = vmatpush1.bf16.msra.mxu0 %v852_v17  ;;  %687 = vmatpush1.bf16.msra.mxu1 %v855_v18  ;;  %v899_v44 = vld [vmem:[#allocation8 + $0x1f4] ss:$8 sps:$4 sm:$0xff]   ;;  %v897_v46 = vld [vmem:[#allocation8 + $0x1f0] ss:$8 sps:$4 sm:$0xff]   ;;  %v902_v47 = vld [vmem:[#allocation8 + $0xe4] ss:$8 sps:$4 sm:$0xff]  }
  0x44   :  { %647 = vmatprep.subr.bf16.mxu0 %v860_v19  ;;  %688 = vmatprep.subr.bf16.mxu1 %v863_v20  ;;  %v905_v48 = vld [vmem:[#allocation8 + $0x1e4] ss:$8 sps:$4 sm:$0xff]   ;;  %v900_v49 = vld [vmem:[#allocation8 + $0xe0] ss:$8 sps:$4 sm:$0xff]   ;;  %v908_v51 = vld [vmem:[#allocation8 + $0xd4] ss:$8 sps:$4 sm:$0xff]  }
  0x45   :  { %v903_v50 = vld [vmem:[#allocation8 + $0x1e0] ss:$8 sps:$4 sm:$0xff]   ;;  %v911_v52 = vld [vmem:[#allocation8 + $0x1d4] ss:$8 sps:$4 sm:$0xff]   ;;  %v906_v53 = vld [vmem:[#allocation8 + $0xd0] ss:$8 sps:$4 sm:$0xff]  }
  0x46   :  { %v909_v54 = vld [vmem:[#allocation8 + $0x1d0] ss:$8 sps:$4 sm:$0xff]   ;;  %v914_v55 = vld [vmem:[#allocation8 + $0xc4] ss:$8 sps:$4 sm:$0xff]   ;;  %v912_v57 = vld [vmem:[#allocation8 + $0xc0] ss:$8 sps:$4 sm:$0xff]  }
  0x47   :  { %648 = vmatpush1.bf16.msra.mxu0 %v858_v21  ;;  %689 = vmatpush1.bf16.msra.mxu1 %v861_v22  ;;  %v917_v56 = vld [vmem:[#allocation8 + $0x1c4] ss:$8 sps:$4 sm:$0xff]   ;;  %v915_v58 = vld [vmem:[#allocation8 + $0x1c0] ss:$8 sps:$4 sm:$0xff]   ;;  %v920_v59 = vld [vmem:[#allocation8 + $0xb4] ss:$8 sps:$4 sm:$0xff]  }
  0x48   :  { %649 = vmatprep.subr.bf16.mxu0 %v866_v23  ;;  %690 = vmatprep.subr.bf16.mxu1 %v869_v24  ;;  %v923_v60 = vld [vmem:[#allocation8 + $0x1b4] ss:$8 sps:$4 sm:$0xff]   ;;  %v918_v61 = vld [vmem:[#allocation8 + $0xb0] ss:$8 sps:$4 sm:$0xff]   ;;  %v926_v63 = vld [vmem:[#allocation8 + $0xa4] ss:$8 sps:$4 sm:$0xff]  }
  0x49   :  { %v921_v62 = vld [vmem:[#allocation8 + $0x1b0] ss:$8 sps:$4 sm:$0xff]   ;;  %v929_v0 = vld [vmem:[#allocation8 + $0x1a4] ss:$8 sps:$4 sm:$0xff]   ;;  %v924_v1 = vld [vmem:[#allocation8 + $0xa0] ss:$8 sps:$4 sm:$0xff]  }
  0x4a   :  { %v927_v2 = vld [vmem:[#allocation8 + $0x1a0] ss:$8 sps:$4 sm:$0xff]   ;;  %v932_v3 = vld [vmem:[#allocation8 + $0x94] ss:$8 sps:$4 sm:$0xff]   ;;  %v930_v5 = vld [vmem:[#allocation8 + $0x90] ss:$8 sps:$4 sm:$0xff]  }
  0x4b   :  { %650 = vmatpush1.bf16.msra.mxu0 %v864_v25  ;;  %691 = vmatpush1.bf16.msra.mxu1 %v867_v26  ;;  %v935_v4 = vld [vmem:[#allocation8 + $0x194] ss:$8 sps:$4 sm:$0xff]   ;;  %v933_v6 = vld [vmem:[#allocation8 + $0x190] ss:$8 sps:$4 sm:$0xff]   ;;  %v936_v7 = vld [vmem:[#allocation8 + $0x80] ss:$8 sps:$4 sm:$0xff]  }
  0x4c   :  { %651 = vmatprep.subr.bf16.mxu0 %v872_v27  ;;  %692 = vmatprep.subr.bf16.mxu1 %v875_v28  ;;  %v938_v8 = vld [vmem:[#allocation8 + $0x84] ss:$8 sps:$4 sm:$0xff]   ;;  %v939_v9 = vld [vmem:[#allocation8 + $0x180] ss:$8 sps:$4 sm:$0xff]   ;;  %v86_v12 = vshrl.u32 %v85_v11, 7  ;;  %s739_s16 = sshll.u32 %s1059_s15, 4  ;;  %s740_s16 = int_to_ptr.vmem [resolvable:$true] %s739_s16 }
  0x4d   :  { %v941_v10 = vld [vmem:[#allocation8 + $0x184] ss:$8 sps:$4 sm:$0xff]   ;;  %v83_v15 = vld [vmem:[#allocation7] sm:$0xf]  ;;  %p1027_p7 = scmp.lt.s32.totalorder %s740_s16, %s740_s16 }
  0x4e   :  { %v87_v13 = vsub.s32 0, %v86_v12  ;;  %v95_v14 = vsub.s32 2, %v86_v12  ;;  %v91_v16 = vsub.s32 1, %v86_v12  ;;  %v99_v17 = vsub.s32 3, %v86_v12 }
  0x4f   :  { %652 = vmatpush1.bf16.msra.mxu0 %v870_v29  ;;  %693 = vmatpush1.bf16.msra.mxu1 %v873_v30 }
  0x50   :  { %653 = vmatprep.subr.bf16.mxu0 %v878_v31  ;;  %694 = vmatprep.subr.bf16.mxu1 %v881_v32  ;;  %v88_v18 = vrot.slane %v83_v15, %v87_v13  ;;  %v96_v19 = vrot.slane %v83_v15, %v95_v14  ;;  %v92_v22 = vrot.slane %v83_v15, %v91_v16 }
  0x51   :  { %v100_v23 = vrot.slane %v83_v15, %v99_v17 }
  0x53   :  { %654 = vmatpush1.bf16.msra.mxu0 %v876_v33  ;;  %695 = vmatpush1.bf16.msra.mxu1 %v879_v34 }
  0x54   :  { %655 = vmatprep.subr.bf16.mxu0 %v884_v35  ;;  %696 = vmatprep.subr.bf16.mxu1 %v887_v36 }
  0x57   :  { %656 = vmatpush1.bf16.msra.mxu0 %v882_v37  ;;  %697 = vmatpush1.bf16.msra.mxu1 %v885_v38 }
  0x58   :  { %657 = vmatprep.subr.bf16.mxu0 %v890_v39  ;;  %698 = vmatprep.subr.bf16.mxu1 %v893_v40 }
  0x5b   :  { %658 = vmatpush1.bf16.msra.mxu0 %v888_v41  ;;  %699 = vmatpush1.bf16.msra.mxu1 %v891_v42 }
  0x5c   :  { %659 = vmatprep.subr.bf16.mxu0 %v896_v43  ;;  %700 = vmatprep.subr.bf16.mxu1 %v899_v44 }
  0x5f   :  { %660 = vmatpush2.bf16.msra.mxu0 %v894_v45  ;;  %701 = vmatpush2.bf16.msra.mxu1 %v897_v46  ;;  %v311_v46 = vld [vmem:[%s1112_s4] sm:$0x3]  ;;  %s1022_s4 = scalar_lea.vmem %s740_s16, 256 }
  0x60   :  { %661 = vmatprep.subr.bf16.mxu0 %v902_v47  ;;  %702 = vmatprep.subr.bf16.mxu1 %v905_v48  ;;  %v316_v47 = vrot.slane %v311_v46, %v87_v13  ;;  %v320_v48 = vrot.slane %v311_v46, %v91_v16  ;;  %p1023_p6 = scmp.ne.s32.totalorder %s740_s16, %s1022_s4  ;;  %p1028_p8 = scmp.lt.s32.totalorder %s1022_s4, %s1022_s4 }
  0x62   :  { %p1029_p9 = por %p1028_p8, %p1027_p7 }
  0x63   :  { %662 = vmatpush2.bf16.msra.mxu0 %v900_v49  ;;  %703 = vmatpush2.bf16.msra.mxu1 %v903_v50 }
  0x64   :  { %663 = vmatprep.subr.bf16.mxu0 %v908_v51  ;;  %704 = vmatprep.subr.bf16.mxu1 %v911_v52  ;;  %p1030_p10 = pnand %p1029_p9, %p1023_p6 }
  0x67   :  { %664 = vmatpush2.bf16.msra.mxu0 %v906_v53  ;;  %705 = vmatpush2.bf16.msra.mxu1 %v909_v54 }
  0x68   :  { %665 = vmatprep.subr.bf16.mxu0 %v914_v55  ;;  %706 = vmatprep.subr.bf16.mxu1 %v917_v56 }
  0x6b   :  { %666 = vmatpush2.bf16.msra.mxu0 %v912_v57  ;;  %707 = vmatpush2.bf16.msra.mxu1 %v915_v58 }
  0x6c   :  { %667 = vmatprep.subr.bf16.mxu0 %v920_v59  ;;  %708 = vmatprep.subr.bf16.mxu1 %v923_v60 }
  0x6f   :  { %668 = vmatpush2.bf16.msra.mxu0 %v918_v61  ;;  %709 = vmatpush2.bf16.msra.mxu1 %v921_v62 }
  0x70   :  { %669 = vmatprep.subr.bf16.mxu0 %v926_v63  ;;  %710 = vmatprep.subr.bf16.mxu1 %v929_v0 }
  0x73   :  { %670 = vmatpush2.bf16.msra.mxu0 %v924_v1  ;;  %711 = vmatpush2.bf16.msra.mxu1 %v927_v2 }
  0x74   :  { %671 = vmatprep.subr.bf16.mxu0 %v932_v3  ;;  %712 = vmatprep.subr.bf16.mxu1 %v935_v4 }
  0x77   :  { %672 = vmatpush2.bf16.msra.mxu0 %v930_v5  ;;  %713 = vmatpush2.bf16.msra.mxu1 %v933_v6 }
  0x78   :  { %673 = vmatprep.subr.bf16.mxu0 %v938_v8  ;;  %714 = vmatprep.subr.bf16.mxu1 %v941_v10 }
  0x7b   :  { %674 = vmatpush2.bf16.msra.mxu0 %v936_v7  ;;  %715 = vmatpush2.bf16.msra.mxu1 %v939_v9 }
  0xfe   :  { %v183_v20 = vpop.f32.mrf.mxu0  ;;  %v224_v21 = vpop.f32.mrf.mxu1 }
  0xff   :  { %v184_v24 = vadd.f32 %v183_v20, %v88_v18  ;;  %v225_v25 = vadd.f32 %v224_v21, %v96_v19 }
 0x100   :  { %v185_v26 = vpop.f32.mrf.mxu0  ;;  %v226_v27 = vpop.f32.mrf.mxu1 }
 0x101   :  { %v235_v28 = vmul.f32 0.2, %v184_v24  ;;  %vm231_vm1 = vcmp.ge.f32.partialorder %v184_v24, 0.0  ;;  %v237_v29 = vmul.f32 0.2, %v225_v25  ;;  %v186_v30 = vadd.f32 %v185_v26, %v92_v22 }
 0x102   :  { %v227_v31 = vadd.f32 %v226_v27, %v100_v23  ;;  %v187_v32 = vpop.f32.mrf.mxu0  ;;  %v228_v33 = vpop.f32.mrf.mxu1  ;;  %vm233_vm2 = vcmp.ge.f32.partialorder %v225_v25, 0.0 }
 0x103   :  { %vm232_vm3 = vcmp.ge.f32.partialorder %v186_v30, 0.0  ;;  %v236_v34 = vmul.f32 0.2, %v186_v30  ;;  %v239_v37 = vsel %vm231_vm1, %v184_v24, %v235_v28  ;;  %v241_v39 = vsel %vm233_vm2, %v225_v25, %v237_v29 }
 0x104   :  { %v188_v35 = vpop.f32.mrf.mxu0  ;;  %v229_v36 = vpop.f32.mrf.mxu1  ;;  %vm234_vm4 = vcmp.ge.f32.partialorder %v227_v31, 0.0  ;;  %v238_v38 = vmul.f32 0.2, %v227_v31  ;;  %v243_v43 = vpack.c.bf16 %v239_v37, %v239_v37  ;;  %v245_v45 = vpack.c.bf16 %v241_v39, %v241_v39 }
 0x105   :  { %v240_v40 = vsel %vm232_vm3, %v186_v30, %v236_v34 }
 0x106   :  { %v244_v41 = vpack.c.bf16 %v240_v40, %v240_v40  ;;  %v242_v42 = vsel %vm234_vm4, %v227_v31, %v238_v38 }
 0x107   :  { %v246_v44 = vpack.c.bf16 %v242_v42, %v242_v42 }
 0x108   :  { %675 = vmatprep.mubr.bf16.mxu0 %v244_v41 }
 0x109   :  { %716 = vmatprep.mubr.bf16.mxu1 %v246_v44  ;;  %676 = vmatmul.mubr.bf16.vlgmr.msra.gmra.mxu0 %v243_v43 }
 0x10a   :  { %717 = vmatmul.mubr.bf16.vlgmr.msra.gmra.mxu1 %v245_v45 }
 0x1c9   :  { %v677_v49 = vpop.f32.mrf.mxu0 }
 0x1ca   :  { %v678_v50 = vadd.f32 %v677_v49, %v316_v47  ;;  %v718_v51 = vpop.f32.mrf.mxu1 }
 0x1cb   :  { %v679_v52 = vpop.f32.mrf.mxu0 }
 0x1cc   :  { %v719_v53 = vadd.f32 %v718_v51, %v678_v50  ;;  %v680_v54 = vadd.f32 %v679_v52, %v320_v48  ;;  %v720_v55 = vpop.f32.mrf.mxu1 }
 0x1cd   :  { %v681_v56 = vpop.f32.mrf.mxu0 }
 0x1ce   :  { %vm725_vm5 = vcmp.ge.f32.partialorder %v719_v53, 0.0  ;;  %v727_v57 = vmul.f32 0.2, %v719_v53  ;;  %v721_v58 = vadd.f32 %v720_v55, %v680_v54  ;;  %v722_v59 = vpop.f32.mrf.mxu1 }
 0x1cf   :  { %v682_v60 = vpop.f32.mrf.mxu0 }
 0x1d0   :  { %vm726_vm6 = vcmp.ge.f32.partialorder %v721_v58, 0.0  ;;  %v728_v61 = vmul.f32 0.2, %v721_v58  ;;  %v723_v62 = vpop.f32.mrf.mxu1  ;;  %v729_v63 = vsel %vm725_vm5, %v719_v53, %v727_v57 }
 0x1d1   :  { %731 = vst [vmem:[#allocation10] sm:$0xff] %v729_v63 }
 0x1d2   :  { %v730_v0 = vsel %vm726_vm6, %v721_v58, %v728_v61 }
 0x1d3   :  { %732 = vst [vmem:[#allocation10 + $0x8] sm:$0xff] %v730_v0 }
 0x1d4   :  { %1033 = shalt.err (!%p1030_p10)
}
 0x1d5   :  { %742 = dma.vmem_to_hbm [thread:$0]  %s740_s16, 256, %s1113_s5, [#allocation4]  }
 0x1d6   :  { %1048 = dma.done.wait [#allocation4], 256  }
 0x1d7   :  { %1049 = vsyncadd [#allocation4], 4294967040 }
 0x1d8   :  { %746 = vsyncpa [#allocation3], 1 }
 0x1d9   :  { %747 = vsyncpa [#allocation6], 1 }
 0x1da   :  { %748 = vsyncpa [#allocation9], 1 }
 0x1db   :  { %749 = vsyncpa [#allocation4], 1 }

</bundles_post_ra>
